<compile_context>
chip_gen: v7x
topology: tpu7x:2x2x1
jax: 0.10.0
libtpu: 0.0.40
codegen_flags: <defaults>
</compile_context>

<pallas_src>
from functools import partial

import jax
import jax.numpy as jnp
from jax.experimental import pallas as pl
from jax.experimental.pallas import tpu as pltpu

LANE = 128


def _round_up(n: int, m: int) -> int:
    return ((n + m - 1) // m) * m


def mlp_kernel(x_ref, w1_ref, b1_ref, w2_ref, b2_ref, o_ref):
    # Layer 1: cast x to bf16 in-kernel (free VPU op), bf16 MXU matmul, f32 accumulation.
    x_bf = x_ref[...].astype(jnp.bfloat16)
    h = jnp.dot(x_bf, w1_ref[...], preferred_element_type=jnp.float32)   # (b, hidden) f32
    # Bias + ReLU in f32 on the VPU (v5e has no bf16 VALU path).
    h = jnp.maximum(h + b1_ref[...], 0.0)
    # Layer 2: bf16 MXU matmul against the lane-padded (hidden, 128) weight, f32 accumulation.
    o = jnp.dot(h.astype(jnp.bfloat16), w2_ref[...],
                preferred_element_type=jnp.float32)                      # (b, n_pad) f32
    o_ref[...] = (o + b2_ref[...]).astype(o_ref.dtype)


def prepare_params(w1, b1, w2, b2):
    """One-time parameter preprocessing (hoisted out of the per-call path).

    w1: (in_dim, hidden), b1: (hidden,) or (1, hidden)
    w2: (hidden, num_classes), b2: (num_classes,) or (1, num_classes)
    Returns bf16 w1, f32 (1,hidden) b1, bf16 lane-padded (hidden,128) w2,
    f32 lane-padded (1,128) b2, and num_classes.
    """
    hidden = w1.shape[1]
    num_classes = w2.shape[1]
    n_pad = max(_round_up(num_classes, LANE), LANE)

    w1_bf = w1.astype(jnp.bfloat16)
    b1_f32 = jnp.asarray(b1, jnp.float32).reshape(1, hidden)
    # Zero-filled padding columns keep the sliced logits exact w.r.t. the unpadded math.
    w2_pad = jnp.zeros((hidden, n_pad), jnp.bfloat16).at[:, :num_classes].set(
        w2.astype(jnp.bfloat16))
    b2_pad = jnp.zeros((1, n_pad), jnp.float32).at[:, :num_classes].set(
        jnp.asarray(b2, jnp.float32).reshape(1, num_classes))
    return w1_bf, b1_f32, w2_pad, b2_pad, num_classes


@partial(jax.jit, static_argnames="num_classes")
def mlp_forward(x_nchw, w1_bf, b1_f32, w2_pad, b2_pad, num_classes=6):
    """x_nchw: (b, 3, H, W) float32. Returns (b, num_classes) float32 logits."""
    b = x_nchw.shape[0]
    x2d = x_nchw.reshape(b, -1)                      # same flattening order as torch .view
    in_dim = x2d.shape[1]
    hidden = w1_bf.shape[1]
    n_pad = w2_pad.shape[1]

    flops = 2 * b * (in_dim * hidden + hidden * n_pad)
    bytes_accessed = (x2d.size * 4 + w1_bf.size * 2 + b1_f32.size * 4
                      + w2_pad.size * 2 + b2_pad.size * 4 + b * n_pad * 4)

    vmem_spec = pl.BlockSpec(memory_space=pltpu.MemorySpace.VMEM)
    out_pad = pl.pallas_call(
        mlp_kernel,
        out_shape=jax.ShapeDtypeStruct((b, n_pad), jnp.float32),
        in_specs=[vmem_spec] * 5,
        out_specs=vmem_spec,
        cost_estimate=pl.CostEstimate(
            flops=flops, transcendentals=0, bytes_accessed=bytes_accessed),
    )(x2d, w1_bf, b1_f32, w2_pad, b2_pad)

    # Lane-slice back to the real class count (fused into the same jit).
    return out_pad[:, :num_classes]


def init_params(key, in_dim, hidden, num_classes, dtype=jnp.float32):
    """Deterministic init mimicking PyTorch nn.Linear defaults (U(-1/sqrt(fan_in), +1/sqrt(fan_in)))."""
    k1, k2, k3, k4 = jax.random.split(key, 4)
    bound1 = 1.0 / jnp.sqrt(in_dim)
    bound2 = 1.0 / jnp.sqrt(hidden)
    w1 = jax.random.uniform(k1, (in_dim, hidden), dtype, -bound1, bound1)
    b1 = jax.random.uniform(k2, (1, hidden), dtype, -bound1, bound1)
    w2 = jax.random.uniform(k3, (hidden, num_classes), dtype, -bound2, bound2)
    b2 = jax.random.uniform(k4, (1, num_classes), dtype, -bound2, bound2)
    return w1, b1, w2, b2


if __name__ == "__main__":
    # Small shapes consistent with the module: batch=2, 3 channels, 16x16 image, 6 classes.
    B, C, H, W = 2, 3, 16, 16
    HIDDEN, NUM_CLASSES = 128, 6
    IN_DIM = C * H * W

    key = jax.random.PRNGKey(0)
    kx, kp = jax.random.split(key)
    x = jax.random.normal(kx, (B, C, H, W), dtype=jnp.float32)
    w1, b1, w2, b2 = init_params(kp, IN_DIM, HIDDEN, NUM_CLASSES)

    # One-time parameter preprocessing (cast / pad), then the jitted forward.
    w1_bf, b1_f32, w2_pad, b2_pad, nc = prepare_params(w1, b1, w2, b2)
    logits = jax.block_until_ready(
        mlp_forward(x, w1_bf, b1_f32, w2_pad, b2_pad, num_classes=nc))

    # Pure-JAX reference modelling the kernel's rounding: bf16-round x/w1/w2 and the hidden
    # activations, accumulate in f32. Matches the kernel up to summation order.
    x2d_r = x.reshape(B, -1).astype(jnp.bfloat16).astype(jnp.float32)
    w1_r = w1.astype(jnp.bfloat16).astype(jnp.float32)
    w2_r = w2.astype(jnp.bfloat16).astype(jnp.float32)
    h_ref = jnp.maximum(x2d_r @ w1_r + b1, 0.0)
    h_ref = h_ref.astype(jnp.bfloat16).astype(jnp.float32)
    ref = h_ref @ w2_r + b2

    assert logits.shape == (B, NUM_CLASSES)
    assert jnp.allclose(logits, ref, atol=2e-3, rtol=2e-3), \
        float(jnp.max(jnp.abs(logits - ref)))

    print("KERNEL_OK")
</pallas_src>

<mosaic_0001>
module attributes {stable_mosaic.version = 11 : i64} {
  func.func @mlp_kernel(%arg0: memref<2x768xf32, #tpu.memory_space<vmem>>, %arg1: memref<768x128xbf16, #tpu.memory_space<vmem>>, %arg2: memref<1x128xf32, #tpu.memory_space<vmem>>, %arg3: memref<128x128xbf16, #tpu.memory_space<vmem>>, %arg4: memref<1x128xf32, #tpu.memory_space<vmem>>, %arg5: memref<2x128xf32, #tpu.memory_space<vmem>>) attributes {dimension_semantics = [], scalar_prefetch = 0 : i64, scratch_operands = 0 : i64, tpu.core_type = #tpu.core_type<tc>} {
    %c0 = arith.constant 0 : index
    %c0_0 = arith.constant 0 : index
    %0 = vector.load %arg0[%c0, %c0_0] : memref<2x768xf32, #tpu.memory_space<vmem>>, vector<2x768xf32>
    %1 = arith.truncf %0 : vector<2x768xf32> to vector<2x768xbf16>
    %c0_1 = arith.constant 0 : index
    %c0_2 = arith.constant 0 : index
    %2 = vector.load %arg1[%c0_1, %c0_2] : memref<768x128xbf16, #tpu.memory_space<vmem>>, vector<768x128xbf16>
    %cst = arith.constant dense<0.000000e+00> : vector<2x128xf32>
    %3 = tpu.matmul %1, %2, %cst {dimension_numbers = #tpu.dot_dimension_numbers<[1], [0], [0], [1], [0, 0, 1, 1], [], []>} : vector<2x768xbf16>, vector<768x128xbf16>, vector<2x128xf32> -> vector<2x128xf32>
    %c0_3 = arith.constant 0 : index
    %c0_4 = arith.constant 0 : index
    %4 = vector.load %arg2[%c0_3, %c0_4] : memref<1x128xf32, #tpu.memory_space<vmem>>, vector<1x128xf32>
    %5 = vector.broadcast %4 : vector<1x128xf32> to vector<2x128xf32>
    %6 = arith.addf %3, %5 : vector<2x128xf32>
    %cst_5 = arith.constant 0.000000e+00 : f32
    %7 = vector.broadcast %cst_5 : f32 to vector<2x128xf32>
    %8 = arith.maximumf %6, %7 : vector<2x128xf32>
    %9 = arith.truncf %8 : vector<2x128xf32> to vector<2x128xbf16>
    %c0_6 = arith.constant 0 : index
    %c0_7 = arith.constant 0 : index
    %10 = vector.load %arg3[%c0_6, %c0_7] : memref<128x128xbf16, #tpu.memory_space<vmem>>, vector<128x128xbf16>
    %cst_8 = arith.constant dense<0.000000e+00> : vector<2x128xf32>
    %11 = tpu.matmul %9, %10, %cst_8 {dimension_numbers = #tpu.dot_dimension_numbers<[1], [0], [0], [1], [0, 0, 1, 1], [], []>} : vector<2x128xbf16>, vector<128x128xbf16>, vector<2x128xf32> -> vector<2x128xf32>
    %c0_9 = arith.constant 0 : index
    %c0_10 = arith.constant 0 : index
    %12 = vector.load %arg4[%c0_9, %c0_10] : memref<1x128xf32, #tpu.memory_space<vmem>>, vector<1x128xf32>
    %13 = vector.broadcast %12 : vector<1x128xf32> to vector<2x128xf32>
    %14 = arith.addf %11, %13 : vector<2x128xf32>
    %c0_11 = arith.constant 0 : index
    %c0_12 = arith.constant 0 : index
    %15 = vector.load %arg5[%c0_11, %c0_12] : memref<2x128xf32, #tpu.memory_space<vmem>>, vector<2x128xf32>
    tpu.vector_store %arg5[%c0_11, %c0_12], %14 {strides = array<i32>} : memref<2x128xf32, #tpu.memory_space<vmem>>, vector<2x128xf32>,
    return
  }
}

</mosaic_0001>

<bundles_post_ra>
// kernel: mlp_forward.1
= control target key start
LH: loop header
LB: loop body
LE: loop exit
PB: predicated region body
PF: predicated region fallthrough
CT: control target
= control target key end

     0   :  { %10 = vsyncpa [#allocation3], 0  ;;  %s1080_s0 = inlined_call_operand.vmem [shape: f32[2,768], index: 0, kind: input, shape index: {}]   ;;  %s1081_s1 = inlined_call_operand.hbm [shape: bf16[768,128], index: 1, kind: input, shape index: {}]   ;;  %s1082_s2 = inlined_call_operand.vmem [shape: f32[1,128], index: 2, kind: input, shape index: {}]   ;;  %s1083_s3 = inlined_call_operand.vmem [shape: bf16[128,128], index: 3, kind: input, shape index: {}]   ;;  %s1084_s4 = inlined_call_operand.vmem [shape: f32[1,128], index: 4, kind: input, shape index: {}]   ;;  %s1085_s5 = inlined_call_operand.hbm [shape: f32[2,128], index: 5, kind: output, shape index: {}]  }
   0x1   :  { %11 = vsyncpa [#allocation4], 0  ;;  %s983_s18 = smov [#allocation2]   ;;  %s935_s22 = scalar_lea.hbm %s1081_s1, 6144 }
   0x2   :  { %s19_s19 = sshll.u32 %s983_s18, 4  ;;  %p936_p0 = scmp.ne.s32.totalorder %s1081_s1, %s935_s22  ;;  %s20_s19 = int_to_ptr.vmem [resolvable:$true] %s19_s19 }
   0x3   :  { %p939_p1 = scmp.lt.u32.totalorder %s935_s22, %s1081_s1 }
   0x5   :  { %p941_p2 = pnand %p939_p1, %p936_p0 }
   0x7   :  { %944 = shalt.err (!%p941_p2)
}
   0x8   :  { %s945_s27 = scalar_lea.vmem %s20_s19, 6144  ;;  %p950_p4 = scmp.lt.s32.totalorder %s20_s19, %s20_s19 }
   0x9   :  { %p946_p3 = scmp.ne.s32.totalorder %s20_s19, %s945_s27  ;;  %p951_p5 = scmp.lt.s32.totalorder %s945_s27, %s945_s27 }
   0xb   :  { %p952_p6 = por %p951_p5, %p950_p4 }
   0xd   :  { %p953_p7 = pnand %p952_p6, %p946_p3 }
   0xf   :  { %956 = shalt.err (!%p953_p7)
}
  0x10   :  { %s984_s28 = smov 64   ;;  %s985_s29 = smov 4  }
  0x11   :  { %25 = dma.hbm_to_vmem [thread:$0]  %s1081_s1, 6144, %s20_s19, [#allocation3], %s984_s28, %s984_s28, %s985_s29  }
  0x12   :  { %979 = dma.done.wait [#allocation3], 6144  }
  0x13   :  { %980 = vsyncadd [#allocation3], 4294961152  ;;  %v878_v0 = vld [vmem:[#allocation2 + $0x40] sm:$0xff]   ;;  %v882_v4 = vld [vmem:[#allocation2 + $0x48] sm:$0xff]   ;;  %v986_v21 = vmov 1983009808   ;;  %v44_v23 = vlaneseq }
  0x14   :  { %v879_v1 = vld [vmem:[#allocation2] sm:$0xff]   ;;  %776 = vmatprep.subr.bf16.mxu0 %v878_v0  ;;  %v883_v5 = vld [vmem:[#allocation2 + $0x8] sm:$0xff]   ;;  %v886_v8 = vld [vmem:[#allocation2 + $0x50] sm:$0xff]   ;;  %v42_v22 = vunpack.c.l.s4 %v986_v21  ;;  %vm988_vm0 = vmmov 0   ;;  %s989_s27 = smov [#allocation5]  }
  0x15   :  { %v880_v2 = vld [vmem:[#allocation2 + $0xc0] sm:$0xff]   ;;  %777 = vmatpush3.bf16.msra.mxu0 %v879_v1  ;;  %v884_v6 = vld [vmem:[#allocation2 + $0xc8] sm:$0xff]   ;;  %v887_v9 = vld [vmem:[#allocation2 + $0x10] sm:$0xff]   ;;  %v45_v29 = vshrl.u32 %v44_v23, 7  ;;  %s708_s28 = sshll.u32 %s989_s27, 4  ;;  %s709_s28 = int_to_ptr.vmem [resolvable:$true] %s708_s28 }
  0x16   :  { %v881_v3 = vld [vmem:[#allocation2 + $0x80] sm:$0xff]   ;;  %798 = vmatprep.subr.bf16.mxu1 %v880_v2  ;;  %778 = vmatprep.subr.bf16.mxu0 %v882_v4  ;;  %v885_v7 = vld [vmem:[#allocation2 + $0x88] sm:$0xff]   ;;  %v888_v10 = vld [vmem:[#allocation2 + $0xd0] sm:$0xff]   ;;  %v43_v28 = vunpack.c.0.s8 %v42_v22  ;;  %s957_s29 = scalar_lea.vmem %s709_s28, 32  ;;  %p962_p9 = scmp.lt.s32.totalorder %s709_s28, %s709_s28 }
  0x17   :  { %799 = vmatpush3.bf16.msra.mxu1 %v881_v3  ;;  %v889_v11 = vld [vmem:[#allocation2 + $0x90] sm:$0xff]   ;;  %v890_v12 = vld [vmem:[#allocation2 + $0x58] sm:$0xff]   ;;  %v894_v16 = vld [vmem:[#allocation2 + $0x60] sm:$0xff]   ;;  %p958_p8 = scmp.ne.s32.totalorder %s709_s28, %s957_s29  ;;  %p963_p10 = scmp.lt.s32.totalorder %s957_s29, %s957_s29 }
  0x18   :  { %800 = vmatprep.subr.bf16.mxu1 %v884_v6  ;;  %v891_v13 = vld [vmem:[#allocation2 + $0x18] sm:$0xff]   ;;  %v895_v17 = vld [vmem:[#allocation2 + $0x20] sm:$0xff]   ;;  %v898_v20 = vld [vmem:[#allocation2 + $0x68] sm:$0xff]   ;;  %v46_v34 = vsub.s32 %v43_v28, %v45_v29 }
  0x19   :  { %779 = vmatpush3.bf16.msra.mxu0 %v883_v5  ;;  %v892_v14 = vld [vmem:[#allocation2 + $0xd8] sm:$0xff]   ;;  %v896_v18 = vld [vmem:[#allocation2 + $0xe0] sm:$0xff]   ;;  %v899_v24 = vld [vmem:[#allocation2 + $0x28] sm:$0xff]   ;;  %v987_v5 = vmov 0.0   ;;  %p964_p11 = por %p963_p10, %p962_p9 }
  0x1a   :  { %780 = vmatprep.subr.bf16.mxu0 %v886_v8  ;;  %v893_v15 = vld [vmem:[#allocation2 + $0x98] sm:$0xff]   ;;  %v897_v19 = vld [vmem:[#allocation2 + $0xa0] sm:$0xff]   ;;  %v900_v25 = vld [vmem:[#allocation2 + $0xe8] sm:$0xff]  }
  0x1b   :  { %801 = vmatpush3.bf16.msra.mxu1 %v885_v7  ;;  %v901_v26 = vld [vmem:[#allocation2 + $0xa8] sm:$0xff]   ;;  %v902_v27 = vld [vmem:[#allocation2 + $0x70] sm:$0xff]   ;;  %v906_v33 = vld [vmem:[#allocation2 + $0x78] sm:$0xff]   ;;  %p965_p12 = pnand %p964_p11, %p958_p8 }
  0x1c   :  { %802 = vmatprep.subr.bf16.mxu1 %v888_v10  ;;  %v903_v30 = vld [vmem:[#allocation2 + $0x30] sm:$0xff]   ;;  %v907_v35 = vld [vmem:[#allocation2 + $0x38] sm:$0xff]   ;;  %v36_v37 = vld [vmem:[%s1080_s0] sm:$0xff] }
  0x1d   :  { %781 = vmatpush3.bf16.msra.mxu0 %v887_v9  ;;  %v904_v31 = vld [vmem:[#allocation2 + $0xf0] sm:$0xff]   ;;  %v908_v36 = vld [vmem:[#allocation2 + $0xf8] sm:$0xff]   ;;  %v47_v38 = vrot.slane %v36_v37, %v46_v34  ;;  %v40_v40 = vcombine.high %v36_v37, %v36_v37  ;;  %v910_v41 = vld [vmem:[#allocation2 + $0x140] sm:$0xff]  }
  0x1e   :  { %782 = vmatprep.subr.bf16.mxu0 %v890_v12  ;;  %v905_v32 = vld [vmem:[#allocation2 + $0xb0] sm:$0xff]   ;;  %v909_v39 = vld [vmem:[#allocation2 + $0xb8] sm:$0xff]   ;;  %v912_v47 = vld [vmem:[#allocation2 + $0x100] sm:$0xff]  }
  0x1f   :  { %803 = vmatpush3.bf16.msra.mxu1 %v889_v11  ;;  %v55_v42 = vcombine.high %v47_v38, %v47_v38  ;;  %v54_v43 = vrot.slane %v40_v40, %v46_v34  ;;  %v71_v44 = vpack.c.bf16 %v47_v38, %v47_v38  ;;  %v913_v49 = vld [vmem:[#allocation2 + $0x148] sm:$0xff]   ;;  %v915_v52 = vld [vmem:[#allocation2 + $0x150] sm:$0xff]   ;;  %v917_v54 = vld [vmem:[#allocation2 + $0x158] sm:$0xff]  }
  0x20   :  { %804 = vmatprep.subr.bf16.mxu1 %v892_v14  ;;  %v914_v51 = vld [vmem:[#allocation2 + $0x108] sm:$0xff]   ;;  %v916_v53 = vld [vmem:[#allocation2 + $0x110] sm:$0xff]   ;;  %v918_v55 = vld [vmem:[#allocation2 + $0x118] sm:$0xff]  }
  0x21   :  { %783 = vmatpush3.bf16.msra.mxu0 %v891_v13  ;;  %v72_v45 = vpack.c.bf16 %v55_v42, %v55_v42  ;;  %v56_v46 = vcombine.high %v54_v43, %v54_v43  ;;  %v73_v48 = vpack.c.bf16 %v54_v43, %v54_v43  ;;  %v919_v56 = vld [vmem:[#allocation2 + $0x160] sm:$0xff]   ;;  %v717_v57 = vld.sshfl [vmem:[%s1080_s0 + $0x8] sm:$0x33 pattern:$0x76325410]  ;;  %v923_v63 = vld [vmem:[#allocation2 + $0x170] sm:$0xff]  }
  0x22   :  { %784 = vmatprep.subr.bf16.mxu0 %v894_v16  ;;  %v64_v58 = vcombine.high %v717_v57, %v717_v57  ;;  %v920_v59 = vld [vmem:[#allocation2 + $0x120] sm:$0xff]   ;;  %v921_v60 = vld [vmem:[#allocation2 + $0x168] sm:$0xff]   ;;  %v924_v0 = vld [vmem:[#allocation2 + $0x130] sm:$0xff]   ;;  %v75_v3 = vpack.c.bf16 %v717_v57, %v717_v57 }
  0x23   :  { %805 = vmatpush3.bf16.msra.mxu1 %v893_v15  ;;  %500 = vmatprep.mubr.bf16.mxu0 %v72_v45  ;;  %v74_v50 = vpack.c.bf16 %v56_v46, %v56_v46  ;;  %v922_v62 = vld [vmem:[#allocation2 + $0x128] sm:$0xff]   ;;  %v925_v1 = vld [vmem:[#allocation2 + $0x178] sm:$0xff]   ;;  %v927_v4 = vld [vmem:[%s1083_s3] sm:$0xff]  }
  0x24   :  { %806 = vmatprep.subr.bf16.mxu1 %v896_v18  ;;  %v76_v61 = vpack.c.bf16 %v64_v58, %v64_v58  ;;  %v926_v2 = vld [vmem:[#allocation2 + $0x138] sm:$0xff]   ;;  %v928_v6 = vld [vmem:[%s1083_s3 + $0x8] sm:$0xff]   ;;  %v929_v7 = vld [vmem:[%s1083_s3 + $0x10] sm:$0xff]  }
  0x25   :  { %785 = vmatpush3.bf16.msra.mxu0 %v895_v17  ;;  %540 = vmatprep.mubr.bf16.mxu1 %v74_v50  ;;  %v930_v8 = vld [vmem:[%s1083_s3 + $0x18] sm:$0xff]   ;;  %v931_v9 = vld [vmem:[%s1083_s3 + $0x20] sm:$0xff]   ;;  %v932_v10 = vld [vmem:[%s1083_s3 + $0x28] sm:$0xff]  }
  0x26   :  { %786 = vmatprep.subr.bf16.mxu0 %v898_v20  ;;  %v933_v11 = vld [vmem:[%s1083_s3 + $0x30] sm:$0xff]   ;;  %v934_v12 = vld [vmem:[%s1083_s3 + $0x38] sm:$0xff]   ;;  %v718_v14 = vld [vmem:[%s1082_s2] ss:$0 sm:$0xff] }
  0x27   :  { %807 = vmatpush3.bf16.msra.mxu1 %v897_v19  ;;  %v767_v34 = vld [vmem:[%s1084_s4] ss:$0 sm:$0xff] }
  0x28   :  { %808 = vmatprep.subr.bf16.mxu1 %v900_v25 }
  0x29   :  { %787 = vmatpush3.bf16.msra.mxu0 %v899_v24 }
  0x2a   :  { %788 = vmatprep.subr.bf16.mxu0 %v902_v27 }
  0x2b   :  { %809 = vmatpush3.bf16.msra.mxu1 %v901_v26 }
  0x2c   :  { %810 = vmatprep.subr.bf16.mxu1 %v904_v31 }
  0x2d   :  { %789 = vmatpush3.bf16.msra.mxu0 %v903_v30 }
  0x2e   :  { %790 = vmatprep.subr.bf16.mxu0 %v906_v33 }
  0x2f   :  { %811 = vmatpush3.bf16.msra.mxu1 %v905_v32 }
  0x30   :  { %812 = vmatprep.subr.bf16.mxu1 %v908_v36 }
  0x31   :  { %791 = vmatpush3.bf16.msra.mxu0 %v907_v35 }
  0x32   :  { %820 = vmatprep.subr.bf16.mxu0 %v910_v41 }
  0x33   :  { %813 = vmatpush3.bf16.msra.mxu1 %v909_v39 }
  0x34   :  { %501 = vmatmul.mubr.bf16.vlgmr.msra.gmra.mrb[0].mxu0 %v71_v44  ;;  %851 = vmatprep.subr.bf16.mxu1 %v987_v5 }
  0x35   :  { %821 = vmatpush3.bf16.msra.mxu0 %v912_v47  ;;  %580 = vmatprep.mubr.bf16.mxu0 %v76_v61 }
  0x36   :  { %541 = vmatmul.mubr.bf16.vlgmr.msra.gmra.mrb[0].mxu1 %v73_v48  ;;  %822 = vmatprep.subr.bf16.mxu0 %v913_v49 }
  0x37   :  { %852 = vmatpush3.bf16.msra.mxu1 %v927_v4  ;;  %867 = vmatprep.mubr.msk.bf16.mxu1 %vm988_vm0, %v987_v5 }
  0x38   :  { %853 = vmatprep.subr.bf16.mxu1 %v987_v5 }
  0x39   :  { %823 = vmatpush3.bf16.msra.mxu0 %v914_v51 }
  0x3a   :  { %824 = vmatprep.subr.bf16.mxu0 %v915_v52 }
  0x3b   :  { %854 = vmatpush3.bf16.msra.mxu1 %v928_v6 }
  0x3c   :  { %855 = vmatprep.subr.bf16.mxu1 %v987_v5 }
  0x3d   :  { %825 = vmatpush3.bf16.msra.mxu0 %v916_v53 }
  0x3e   :  { %826 = vmatprep.subr.bf16.mxu0 %v917_v54 }
  0x3f   :  { %856 = vmatpush3.bf16.msra.mxu1 %v929_v7 }
  0x40   :  { %857 = vmatprep.subr.bf16.mxu1 %v987_v5 }
  0x41   :  { %827 = vmatpush3.bf16.msra.mxu0 %v918_v55 }
  0x42   :  { %828 = vmatprep.subr.bf16.mxu0 %v919_v56 }
  0x43   :  { %858 = vmatpush3.bf16.msra.mxu1 %v930_v8 }
  0x44   :  { %859 = vmatprep.subr.bf16.mxu1 %v987_v5 }
  0x45   :  { %829 = vmatpush3.bf16.msra.mxu0 %v920_v59 }
  0x46   :  { %830 = vmatprep.subr.bf16.mxu0 %v921_v60 }
  0x47   :  { %860 = vmatpush3.bf16.msra.mxu1 %v931_v9 }
  0x48   :  { %861 = vmatprep.subr.bf16.mxu1 %v987_v5 }
  0x49   :  { %831 = vmatpush3.bf16.msra.mxu0 %v922_v62 }
  0x4a   :  { %832 = vmatprep.subr.bf16.mxu0 %v923_v63 }
  0x4b   :  { %862 = vmatpush3.bf16.msra.mxu1 %v932_v10 }
  0x4c   :  { %863 = vmatprep.subr.bf16.mxu1 %v987_v5 }
  0x4d   :  { %833 = vmatpush3.bf16.msra.mxu0 %v924_v0 }
  0x4e   :  { %834 = vmatprep.subr.bf16.mxu0 %v925_v1 }
  0x4f   :  { %864 = vmatpush3.bf16.msra.mxu1 %v933_v11 }
  0x50   :  { %865 = vmatprep.subr.bf16.mxu1 %v987_v5 }
  0x51   :  { %835 = vmatpush3.bf16.msra.mxu0 %v926_v2 }
  0x53   :  { %866 = vmatpush3.bf16.msra.mxu1 %v934_v12 }
  0x54   :  { %581 = vmatmul.mubr.bf16.vlgmr.msra.gmra.mrb[4].mxu0 %v75_v3 }
 0x107   :  { %v792_v13 = vpop.f32.mrb[0].mxu0 }
 0x108   :  { %v793_v15 = vpop.f32.mrb[1].mxu0 }
 0x109   :  { %v794_v16 = vadd.f32 %v793_v15, %v792_v13  ;;  %v795_v17 = vpop.f32.mrb[2].mxu0  ;;  %v814_v18 = vpop.f32.mrb[0].mxu1 }
 0x10a   :  { %v796_v19 = vpop.f32.mrb[3].mxu0  ;;  %v815_v20 = vpop.f32.mrb[1].mxu1 }
 0x10b   :  { %v503_v21 = vadd.f32 %v794_v16, %v718_v14  ;;  %v816_v22 = vadd.f32 %v815_v20, %v814_v18  ;;  %v817_v23 = vpop.f32.mrb[2].mxu1 }
 0x10c   :  { %v818_v24 = vpop.f32.mrb[3].mxu1 }
 0x10d   :  { %v543_v25 = vadd.f32 %v816_v22, %v503_v21 }
 0x127   :  { %v836_v26 = vpop.f32.mrb[4].mxu0 }
 0x128   :  { %v837_v27 = vpop.f32.mrb[5].mxu0 }
 0x129   :  { %v838_v28 = vadd.f32 %v837_v27, %v836_v26  ;;  %v839_v29 = vpop.f32.mrb[6].mxu0 }
 0x12a   :  { %v840_v30 = vpop.f32.mrb[7].mxu0 }
 0x12b   :  { %v583_v31 = vadd.f32 %v838_v28, %v543_v25 }
 0x12d   :  { %v588_v32 = vmax.f32 %v583_v31, 0.0 }
 0x12f   :  { %v589_v33 = vpack.c.bf16 %v588_v32, %v588_v32 }
 0x131   :  { %868 = vmatmul.mubr.bf16.vlgmr.msra.gmra.mrb[4].mxu1 %v589_v33 }
 0x204   :  { %v695_v35 = vpop.f32.mrb[4].mxu1 }
 0x205   :  { %v696_v36 = vadd.f32 %v767_v34, %v695_v35  ;;  %v869_v37 = vpop.f32.mrb[5].mxu1 }
 0x206   :  { %v698_v38 = vpop.f32.mrb[6].mxu1 }
 0x207   :  { %701 = vst [vmem:[#allocation5] sm:$0x3] %v696_v36  ;;  %v870_v39 = vpop.f32.mrb[7].mxu1 }
 0x208   :  { %968 = shalt.err (!%p965_p12)
}
 0x209   :  { %s969_s4 = scalar_lea.hbm %s1085_s5, 32 }
 0x20a   :  { %p970_p13 = scmp.ne.s32.totalorder %s1085_s5, %s969_s4  ;;  %p973_p0 = scmp.lt.u32.totalorder %s969_s4, %s1085_s5 }
 0x20c   :  { %p975_p1 = pnand %p973_p0, %p970_p13 }
 0x20e   :  { %978 = shalt.err (!%p975_p1)
}
 0x20f   :  { %711 = dma.vmem_to_hbm [thread:$0]  %s709_s28, 32, %s1085_s5, [#allocation4]  }
 0x210   :  { %981 = dma.done.wait [#allocation4], 32  }
 0x211   :  { %982 = vsyncadd [#allocation4], 4294967264 }
 0x212   :  { %715 = vsyncpa [#allocation3], 1 }
 0x213   :  { %716 = vsyncpa [#allocation4], 1 }

</bundles_post_ra>
